<compile_context>
chip_gen: v7x
topology: tpu7x:2x2x1
jax: 0.10.0
libtpu: 0.0.40
codegen_flags: <defaults>
</compile_context>

<pallas_src>
import jax
import jax.numpy as jnp
from jax.experimental import pallas as pl
from jax.experimental.pallas import tpu as pltpu


def _copy_kernel(x_ref, o_ref):
    # Identity move of one (row_tile, lane_tile) slab of the flattened obs.
    o_ref[...] = x_ref[...]


# Keep 4 * tile_bytes (double-buffered input + output) under this budget so
# the kernel fits the default 32 MiB scoped VMEM limit on v5e/v6e/v7x.
_VMEM_BUDGET_BYTES = 24 * 1024 * 1024


def _pallas_identity_copy(flat: jnp.ndarray) -> jnp.ndarray:
    """Identity copy of a (B, F) array through a Pallas TPU kernel."""
    B, F = flat.shape
    total = B * F
    itemsize = jnp.dtype(flat.dtype).itemsize

    # Prefer an (R, L) view of the flat buffer with L a multiple of 128
    # (lane dense) and R >= 8 (full sublanes even when B is tiny).
    slab = None
    for L_cand in (4096, 2048, 1024, 512, 256, 128):
        if total % L_cand == 0 and total // L_cand >= 8:
            slab = (total // L_cand, L_cand)
            break
    if slab is None:
        for L_cand in (4096, 2048, 1024, 512, 256, 128):
            if total % L_cand == 0:
                slab = (total // L_cand, L_cand)
                break

    if slab is not None:
        R, L = slab
        x2d = flat.reshape(R, L)           # metadata-only re-view
        lane_tile = L                      # multiple of 128, <= 4096
    else:
        # Ragged fallback (total not divisible by 128): tile (B, F) directly;
        # the cdiv grid masks the partial last lane block.
        R, L = B, F
        x2d = flat
        lane_tile = L if L <= 2048 else 2048

    # Row tile: as large as the VMEM budget allows, multiple of 8 (or the
    # full row extent, which is always a legal block dim).
    budget_rows = _VMEM_BUDGET_BYTES // (4 * lane_tile * itemsize)
    if budget_rows >= R:
        row_tile = R
    else:
        row_tile = max(8, (budget_rows // 8) * 8)

    grid = (pl.cdiv(R, row_tile), pl.cdiv(L, lane_tile))

    out2d = pl.pallas_call(
        _copy_kernel,
        out_shape=jax.ShapeDtypeStruct((R, L), flat.dtype),
        grid=grid,
        in_specs=[pl.BlockSpec((row_tile, lane_tile), lambda i, j: (i, j))],
        out_specs=pl.BlockSpec((row_tile, lane_tile), lambda i, j: (i, j)),
        compiler_params=pltpu.CompilerParams(
            dimension_semantics=("parallel", "parallel")
        ),
    )(x2d)

    return out2d.reshape(B, F)


class FlattenExtractorPallas:
    """JAX/Pallas analogue of SB3 FlattenExtractor (BaseFeaturesExtractor)."""

    def __init__(self, observation_shape, features_dim: int = 0,
                 use_pallas_copy: bool = False):
        assert features_dim > 0
        self._observation_shape = tuple(observation_shape)
        self._features_dim = int(features_dim)
        # Default is the metadata-only reshape (zero HBM traffic); the Pallas
        # copy path exists only as an explicit fusion/benchmark anchor.
        self._use_pallas_copy = bool(use_pallas_copy)

    @property
    def features_dim(self) -> int:
        return self._features_dim

    def forward(self, observations: jnp.ndarray) -> jnp.ndarray:
        B = observations.shape[0]
        # Row-major flatten of the per-sample observation: identical element
        # order to torch nn.Flatten on a contiguous NCHW tensor.
        flat = observations.reshape(B, -1)
        F = flat.shape[1]
        assert F == self._features_dim, (F, self._features_dim)

        if not self._use_pallas_copy:
            return flat  # fast path: flatten is free in XLA

        return _pallas_identity_copy(flat)

    def __call__(self, observations: jnp.ndarray) -> jnp.ndarray:
        return self.forward(observations)


if __name__ == "__main__":
    key = jax.random.PRNGKey(0)
    B, C, H, W = 2, 4, 16, 16                      # small NCHW observation
    x = jax.random.normal(key, (B, C, H, W), dtype=jnp.float32)
    features_dim = C * H * W                       # 1024
    y_ref = x.reshape(B, -1)                       # torch.flatten reference

    # Fast (default) path: pure reshape, no kernel.
    fast = FlattenExtractorPallas((C, H, W), features_dim=features_dim)
    y_fast = jax.block_until_ready(fast(x))
    assert y_fast.shape == (B, features_dim)
    assert bool(jnp.array_equal(y_fast, y_ref)), "fast-path mismatch"

    # Pallas copy path: exercises the kernel once.
    extractor = FlattenExtractorPallas((C, H, W), features_dim=features_dim,
                                       use_pallas_copy=True)
    y = jax.block_until_ready(extractor(x))
    assert y.shape == (B, features_dim), y.shape
    assert y.dtype == x.dtype
    assert bool(jnp.allclose(y, y_ref)), "mismatch vs flatten reference"

    print("KERNEL_OK")
</pallas_src>

<mosaic_0001>
module attributes {stable_mosaic.version = 11 : i64} {
  func.func @_copy_kernel(%arg0: i32, %arg1: i32, %arg2: memref<8x256xf32, #tpu.memory_space<vmem>>, %arg3: memref<8x256xf32, #tpu.memory_space<vmem>>) attributes {dimension_semantics = [#tpu.dimension_semantics<parallel>, #tpu.dimension_semantics<parallel>], iteration_bounds = array<i64: 1, 1>, scalar_prefetch = 0 : i64, scratch_operands = 0 : i64, tpu.core_type = #tpu.core_type<tc>, window_params = [{transform_indices = @transform_0, window_bounds = array<i64: 8, 256>}, {transform_indices = @transform_1, window_bounds = array<i64: 8, 256>}]} {
    %c0 = arith.constant 0 : index
    %c0_0 = arith.constant 0 : index
    %0 = vector.load %arg2[%c0, %c0_0] : memref<8x256xf32, #tpu.memory_space<vmem>>, vector<8x256xf32>
    %c0_1 = arith.constant 0 : index
    %c0_2 = arith.constant 0 : index
    %1 = vector.load %arg3[%c0_1, %c0_2] : memref<8x256xf32, #tpu.memory_space<vmem>>, vector<8x256xf32>
    tpu.vector_store %arg3[%c0_1, %c0_2], %0 {strides = array<i32>} : memref<8x256xf32, #tpu.memory_space<vmem>>, vector<8x256xf32>,
    return
  }
  func.func @transform_0(%arg0: i32, %arg1: i32) -> (i32, i32) {
    %c0_i32 = arith.constant 0 : i32
    return %arg0, %arg1 : i32, i32
  }
  func.func @transform_1(%arg0: i32, %arg1: i32) -> (i32, i32) {
    %c0_i32 = arith.constant 0 : i32
    return %arg0, %arg1 : i32, i32
  }
}

</mosaic_0001>

<bundles_post_ra>
// kernel: tpu_custom_call.1
= control target key start
LH: loop header
LB: loop body
LE: loop exit
PB: predicated region body
PF: predicated region fallthrough
CT: control target
= control target key end

     0   :  { %6 = vsyncpa [#allocation3], 0  ;;  %s126_s0 = inlined_call_operand.hbm [shape: f32[8,256], index: 0, kind: input, shape index: {}]   ;;  %s127_s1 = inlined_call_operand.hbm [shape: f32[8,256], index: 1, kind: output, shape index: {}]  }
   0x1   :  { %7 = vsyncpa [#allocation4], 0  ;;  %s90_s6 = smov [#allocation2]   ;;  %s42_s10 = scalar_lea.hbm %s126_s0, 256 }
   0x2   :  { %s14_s7 = sshll.u32 %s90_s6, 4  ;;  %p43_p0 = scmp.ne.s32.totalorder %s126_s0, %s42_s10  ;;  %s15_s7 = int_to_ptr.vmem [resolvable:$true] %s14_s7 }
   0x3   :  { %p46_p1 = scmp.lt.u32.totalorder %s42_s10, %s126_s0 }
   0x5   :  { %p48_p2 = pnand %p46_p1, %p43_p0 }
   0x7   :  { %51 = shalt.err (!%p48_p2)
}
   0x8   :  { %s52_s15 = scalar_lea.vmem %s15_s7, 256  ;;  %p57_p4 = scmp.lt.s32.totalorder %s15_s7, %s15_s7 }
   0x9   :  { %p53_p3 = scmp.ne.s32.totalorder %s15_s7, %s52_s15  ;;  %p58_p5 = scmp.lt.s32.totalorder %s52_s15, %s52_s15 }
   0xb   :  { %p59_p6 = por %p58_p5, %p57_p4 }
   0xd   :  { %p60_p7 = pnand %p59_p6, %p53_p3 }
   0xf   :  { %63 = shalt.err (!%p60_p7)
}
  0x10   :  { %17 = dma.hbm_to_vmem [thread:$0]  %s126_s0, 256, %s15_s7, [#allocation3]  }
  0x11   :  { %86 = dma.done.wait [#allocation3], 256  }
  0x12   :  { %87 = vsyncadd [#allocation3], 4294967040  ;;  %s91_s18 = smov [#allocation5]   ;;  %v21_v0 = vld [vmem:[#allocation2] sm:$0xff]  ;;  %v22_v1 = vld [vmem:[#allocation2 + $0x8] sm:$0xff] }
  0x13   :  { %s31_s19 = sshll.u32 %s91_s18, 4  ;;  %23 = vst [vmem:[#allocation5] sm:$0xff] %v21_v0  ;;  %24 = vst [vmem:[#allocation5 + $0x8] sm:$0xff] %v22_v1  ;;  %s32_s19 = int_to_ptr.vmem [resolvable:$true] %s31_s19 }
  0x14   :  { %s64_s20 = scalar_lea.vmem %s32_s19, 256  ;;  %p69_p9 = scmp.lt.s32.totalorder %s32_s19, %s32_s19 }
  0x15   :  { %p65_p8 = scmp.ne.s32.totalorder %s32_s19, %s64_s20  ;;  %p70_p10 = scmp.lt.s32.totalorder %s64_s20, %s64_s20 }
  0x17   :  { %p71_p11 = por %p70_p10, %p69_p9 }
  0x19   :  { %p72_p12 = pnand %p71_p11, %p65_p8 }
  0x1b   :  { %75 = shalt.err (!%p72_p12)
}
  0x1c   :  { %s76_s0 = scalar_lea.hbm %s127_s1, 256 }
  0x1d   :  { %p77_p13 = scmp.ne.s32.totalorder %s127_s1, %s76_s0  ;;  %p80_p0 = scmp.lt.u32.totalorder %s76_s0, %s127_s1 }
  0x1f   :  { %p82_p1 = pnand %p80_p0, %p77_p13 }
  0x21   :  { %85 = shalt.err (!%p82_p1)
}
  0x22   :  { %34 = dma.vmem_to_hbm [thread:$0]  %s32_s19, 256, %s127_s1, [#allocation4]  }
  0x23   :  { %88 = dma.done.wait [#allocation4], 256  }
  0x24   :  { %89 = vsyncadd [#allocation4], 4294967040 }
  0x25   :  { %38 = vsyncpa [#allocation3], 1 }
  0x26   :  { %39 = vsyncpa [#allocation4], 1 }

</bundles_post_ra>
